<compile_context>
chip_gen: v7x
topology: tpu7x:2x2x1
jax: 0.10.0
libtpu: 0.0.40
codegen_flags: <defaults>
</compile_context>

<pallas_src>
import functools
import math

import jax
import jax.numpy as jnp
from jax.experimental import pallas as pl
from jax.experimental.pallas import tpu as pltpu


def _round_up(x, m):
    return (x + m - 1) // m * m


def _lcm(a, b):
    return a * b // math.gcd(a, b)


def _lane_pad(width):
    """Pad a feature width to the MXU column tile.

    128 always; on v6e/v7x (256-wide MXU) widths above 128 round to 256 so the
    dominant N^2 contraction runs at full MXU column utilization.  Misdetection
    only changes padding (performance), never correctness.
    """
    base = 128
    try:
        kind = jax.devices()[0].device_kind.lower()
        if ("v6" in kind or "v7" in kind) and width > 128:
            base = 256
    except Exception:
        pass
    return _round_up(width, base)


def _gcn_layer_kernel(x_ref, adj_ref, w_ref, b_ref, alpha_ref,
                      h_ref, psum_ref, acc_ref,
                      *, adj_first, tm, tk, n_valid):
    """One GCN layer, tiled over node rows (i) and the adj contraction (k).

    x_ref    : (Np, Win)  bf16, whole (padded) node-feature matrix, VMEM resident
    adj_ref  : (tm, tk)   bf16, streamed adjacency block
    w_ref    : (Win, fp)  bf16, pre-transposed, zero-padded weight
    b_ref    : (1, fp)    f32,  zero-padded bias
    alpha_ref: (1,)       f32,  PReLU slope (SMEM scalar)
    h_ref    : (tm, fp)   bf16, layer output rows for this row tile
    psum_ref : (8, fp)    f32,  per-row-tile node-sum partial (row 0 carries it)
    acc_ref  : (tm, Win or fp) f32 accumulator scratch
    """
    i = pl.program_id(1)
    k = pl.program_id(2)
    n_k = pl.num_programs(2)

    @pl.when(k == 0)
    def _init():
        acc_ref[...] = jnp.zeros_like(acc_ref)

    a_blk = adj_ref[...]                                        # (tm, tk) bf16
    start = pl.multiple_of(k * tk, 128 if tk % 128 == 0 else 8)
    x_blk = x_ref[pl.ds(start, tk), :]                          # (tk, Win) bf16

    if adj_first:
        # z = (adj @ x) @ W : carry the (rounded-narrower) input width through
        # the N^2 contraction; single non-redundant linear at the end.
        acc_ref[...] += jnp.dot(a_blk, x_blk,
                                preferred_element_type=jnp.float32)
    else:
        # z = adj @ (x @ W) : input width is (MXU-rounded) wider than output.
        t = jnp.dot(x_blk, w_ref[...], preferred_element_type=jnp.float32)
        acc_ref[...] += jnp.dot(a_blk, t.astype(jnp.bfloat16),
                                preferred_element_type=jnp.float32)

    @pl.when(k == n_k - 1)
    def _finalize():
        if adj_first:
            z = jnp.dot(acc_ref[...].astype(jnp.bfloat16), w_ref[...],
                        preferred_element_type=jnp.float32)
        else:
            z = acc_ref[...]
        z = z + b_ref[...]                                      # (tm, fp) f32
        alpha = alpha_ref[0]                                    # PReLU slope
        hf = jnp.where(z >= 0, z, alpha * z)
        # Zero padded node rows so sums / next layer stay clean even if bias != 0.
        row = i * tm + jax.lax.broadcasted_iota(jnp.int32, hf.shape, 0)
        hf = jnp.where(row < n_valid, hf, 0.0)
        h_ref[...] = hf.astype(h_ref.dtype)                     # bf16 writeback
        s = jnp.sum(hf, axis=0, keepdims=True)                  # XLU reduce, ~free
        psum_ref[...] = jnp.broadcast_to(s, psum_ref.shape)


def _gcn_layer(x, adj, wt, bias, alpha, *, n_valid, tm, tk, adj_first):
    """Runs one GCN layer.  Returns (h [B,Np,fp] bf16, node_sum [B,fp] f32)."""
    B, Np, win = x.shape
    fp = wt.shape[1]
    n_i, n_k = Np // tm, Np // tk
    acc_w = win if adj_first else fp

    kernel = functools.partial(_gcn_layer_kernel, adj_first=adj_first,
                               tm=tm, tk=tk, n_valid=n_valid)

    # Advisory cost estimate for XLA scheduling around the custom call.
    flops = 2 * B * (Np * Np * (win if adj_first else fp)
                     + Np * win * fp * (1 if adj_first else n_i))
    bytes_accessed = (B * (Np * Np * 2 + Np * win * 2 + Np * fp * 2
                           + n_i * 8 * fp * 4)
                      + win * fp * 2 + fp * 4 + 4)

    # Explicit VMEM budget sized from the real footprint (double buffers etc.).
    vmem_bytes = (2 * tm * tk * 2            # adj blocks (dbl-buffered bf16)
                  + 2 * Np * win * 2         # resident x (dbl-buffered bf16)
                  + win * fp * 2 + fp * 4    # weight / bias
                  + 2 * tm * fp * 2          # h output blocks
                  + 2 * 8 * fp * 4           # psum output blocks
                  + tm * acc_w * 4           # accumulator scratch
                  + 6 * tm * max(win, fp) * 4)   # z / hf / cast headroom
    vmem_limit = int(min(64 << 20, max(32 << 20, 2 * vmem_bytes)))

    h, psum = pl.pallas_call(
        kernel,
        out_shape=(
            jax.ShapeDtypeStruct((B, Np, fp), jnp.bfloat16),
            jax.ShapeDtypeStruct((B, n_i, 8, fp), jnp.float32),
        ),
        grid=(B, n_i, n_k),
        in_specs=[
            pl.BlockSpec((None, Np, win), lambda b, i, k: (b, 0, 0)),   # x
            pl.BlockSpec((None, tm, tk), lambda b, i, k: (b, i, k)),    # adj
            pl.BlockSpec((win, fp), lambda b, i, k: (0, 0)),            # W^T
            pl.BlockSpec((1, fp), lambda b, i, k: (0, 0)),              # bias
            pl.BlockSpec(memory_space=pltpu.MemorySpace.SMEM),          # alpha
        ],
        out_specs=(
            pl.BlockSpec((None, tm, fp), lambda b, i, k: (b, i, 0)),
            pl.BlockSpec((None, None, 8, fp), lambda b, i, k: (b, i, 0, 0)),
        ),
        scratch_shapes=[pltpu.VMEM((tm, acc_w), jnp.float32)],
        compiler_params=pltpu.CompilerParams(
            dimension_semantics=("parallel", "parallel", "arbitrary"),
            vmem_limit_bytes=vmem_limit),
        cost_estimate=pl.CostEstimate(flops=int(flops), transcendentals=0,
                                      bytes_accessed=int(bytes_accessed)),
    )(x, adj, wt, bias, alpha)

    node_sum = psum[:, :, 0, :].sum(axis=1)          # finish across row tiles
    return h, node_sum


def gcn_forward(params, feat, adj, mask=None, *, tile_m=None, tile_k=None):
    """GCN.forward: returns (h_1, h_1g).  `mask` is unused, as in PyTorch."""
    del mask
    B, N, fin = feat.shape
    fout = params[0][0].shape[0]

    fin_p = _lane_pad(fin)
    fp = _lane_pad(fout)

    # ---- node tiling -------------------------------------------------------
    if tile_m is None or tile_k is None:
        if N <= 512:
            tm = tk = _round_up(N, 8)        # single tile, full graph per step
        else:
            tm, tk = 256, 512
    else:
        tm, tk = tile_m, tile_k
    Np = _round_up(N, _lcm(tm, tk))
    assert tm % 8 == 0 and Np % tm == 0 and Np % tk == 0
    assert tk % 128 == 0 or tk == Np, "contraction tile must be lane-aligned"

    # ---- pad inputs (zero rows/cols contribute nothing) --------------------
    feat_b = feat.astype(jnp.bfloat16)
    adj_b = adj.astype(jnp.bfloat16)
    if Np == N and fin_p == fin:
        feat_p = feat_b
    else:
        feat_p = jnp.zeros((B, Np, fin_p), jnp.bfloat16).at[:, :N, :fin].set(feat_b)
    if Np == N:
        adj_p = adj_b
    else:
        adj_p = jnp.zeros((B, Np, Np), jnp.bfloat16).at[:, :N, :N].set(adj_b)

    # ---- run layers --------------------------------------------------------
    x = feat_p
    win = fin_p
    h = None
    h1g_parts = []
    for (w, b, alpha) in params:
        f_out_l, f_in_l = w.shape
        wt = jnp.zeros((win, fp), jnp.bfloat16).at[:f_in_l, :f_out_l].set(
            w.T.astype(jnp.bfloat16))
        bp = jnp.zeros((1, fp), jnp.float32).at[0, :f_out_l].set(
            b.astype(jnp.float32))
        al = jnp.asarray(alpha, jnp.float32).reshape((1,))
        adj_first = (win <= fp)              # MXU-tile-rounded widths
        h, s = _gcn_layer(x, adj_p, wt, bp, al, n_valid=N,
                          tm=tm, tk=tk, adj_first=adj_first)
        h1g_parts.append(s[:, :fout])
        x = h                                # bf16 output feeds the next layer
        win = fp

    h_1 = h[:, :N, :fout].astype(jnp.float32)
    h_1g = jnp.concatenate(h1g_parts, axis=-1)
    return h_1, h_1g


def init_gcn_params(key, in_ft, out_ft, num_layers, bias_fill=0.0, alpha=0.25):
    """Parameter init matching the PyTorch module's __init__ (xavier, bias=0)."""
    params = []
    fin = in_ft
    for _ in range(num_layers):
        key, sub = jax.random.split(key)
        bound = (6.0 / (fin + out_ft)) ** 0.5          # xavier_uniform_
        w = jax.random.uniform(sub, (out_ft, fin), jnp.float32,
                               minval=-bound, maxval=bound)
        b = jnp.full((out_ft,), bias_fill, jnp.float32)
        params.append((w, b, jnp.float32(alpha)))       # nn.PReLU() scalar slope
        fin = out_ft
    return params


def reference_forward(params, feat, adj):
    """Pure-JAX reference mirroring the kernel math exactly (bf16 in, f32 acc)."""
    fin = feat.shape[-1]
    fout = params[0][0].shape[0]
    fin_p, fp = _lane_pad(fin), _lane_pad(fout)

    h = feat.astype(jnp.bfloat16)
    a = adj.astype(jnp.bfloat16)
    win = fin_p
    h1g = []
    hf = None
    for (w, b, alpha) in params:
        wt = w.T.astype(jnp.bfloat16)
        if win <= fp:        # same association rule as the kernel
            acc = jnp.einsum('bmn,bnf->bmf', a, h,
                             preferred_element_type=jnp.float32)
            z = jnp.einsum('bmf,fo->bmo', acc.astype(jnp.bfloat16), wt,
                           preferred_element_type=jnp.float32)
        else:
            t = jnp.einsum('bnf,fo->bno', h, wt,
                           preferred_element_type=jnp.float32)
            z = jnp.einsum('bmn,bno->bmo', a, t.astype(jnp.bfloat16),
                           preferred_element_type=jnp.float32)
        z = z + b.astype(jnp.float32)
        alpha = jnp.asarray(alpha, jnp.float32)
        hf = jnp.where(z >= 0, z, alpha * z)
        h1g.append(jnp.sum(hf, axis=1))
        h = hf.astype(jnp.bfloat16)
        win = fp
    # Kernel returns the bf16-rounded h cast back to f32; mirror that.
    return h.astype(jnp.float32), jnp.concatenate(h1g, axis=-1)


if __name__ == "__main__":
    key = jax.random.PRNGKey(0)
    k_feat, k_adj, k_par, k_feat2, k_adj2 = jax.random.split(key, 5)

    # ---- test 1: small graph (single-tile path) ----------------------------
    B, N = 2, 16
    in_ft, out_ft, num_layers = 8, 32, 2

    feat = jax.random.normal(k_feat, (B, N, in_ft), jnp.float32)
    adj_raw = jax.random.uniform(k_adj, (B, N, N), jnp.float32)
    adj = 0.5 * (adj_raw + jnp.swapaxes(adj_raw, 1, 2))
    mask = jnp.ones((B, N), jnp.float32)               # unused, as in PyTorch

    params = init_gcn_params(k_par, in_ft, out_ft, num_layers)

    h_1, h_1g = gcn_forward(params, feat, adj, mask)
    jax.block_until_ready((h_1, h_1g))

    h_ref, hg_ref = reference_forward(params, feat, adj)
    assert h_1.shape == (B, N, out_ft)
    assert h_1g.shape == (B, out_ft * num_layers)
    assert jnp.allclose(h_1, h_ref, atol=1e-2, rtol=1e-2)
    assert jnp.allclose(h_1g, hg_ref, atol=5e-2, rtol=1e-2)

    # ---- test 2: odd-sized graph, forced row/contraction tiling + padding --
    B2, N2 = 1, 200
    feat2 = jax.random.normal(k_feat2, (B2, N2, in_ft), jnp.float32)
    adj2 = jax.random.uniform(k_adj2, (B2, N2, N2), jnp.float32)
    # nonzero bias exercises the padded-row masking path
    params2 = init_gcn_params(k_par, in_ft, out_ft, num_layers,
                              bias_fill=0.3, alpha=0.1)

    h_2, h_2g = gcn_forward(params2, feat2, adj2, None, tile_m=64, tile_k=128)
    jax.block_until_ready((h_2, h_2g))

    h2_ref, hg2_ref = reference_forward(params2, feat2, adj2)
    assert h_2.shape == (B2, N2, out_ft)
    assert h_2g.shape == (B2, out_ft * num_layers)
    assert jnp.allclose(h_2, h2_ref, atol=5e-2, rtol=2e-2)
    assert jnp.allclose(h_2g, hg2_ref, atol=5e-1, rtol=2e-2)

    print("KERNEL_OK")
</pallas_src>

<mosaic_0001>
module attributes {stable_mosaic.version = 11 : i64} {
  func.func @_gcn_layer_kernel(%arg0: i32, %arg1: i32, %arg2: i32, %arg3: memref<1x16x128xbf16, #tpu.memory_space<vmem>>, %arg4: memref<1x16x16xbf16, #tpu.memory_space<vmem>>, %arg5: memref<128x128xbf16, #tpu.memory_space<vmem>>, %arg6: memref<1x128xf32, #tpu.memory_space<vmem>>, %arg7: memref<1xf32, #tpu.memory_space<smem>>, %arg8: memref<1x16x128xbf16, #tpu.memory_space<vmem>>, %arg9: memref<1x1x8x128xf32, #tpu.memory_space<vmem>>, %arg10: memref<16x128xf32, #tpu.memory_space<vmem>>) attributes {dimension_semantics = [#tpu.dimension_semantics<parallel>, #tpu.dimension_semantics<parallel>, #tpu.dimension_semantics<arbitrary>], iteration_bounds = array<i64: 2, 1, 1>, scalar_prefetch = 0 : i64, scratch_operands = 1 : i64, tpu.core_type = #tpu.core_type<tc>, window_params = [{transform_indices = @transform_0, window_bounds = array<i64: 1, 16, 128>}, {transform_indices = @transform_1, window_bounds = array<i64: 1, 16, 16>}, {pipeline_mode = #tpu.pipeline_mode<synchronous>, transform_indices = @transform_2, window_bounds = array<i64: 128, 128>}, {pipeline_mode = #tpu.pipeline_mode<synchronous>, transform_indices = @transform_3, window_bounds = array<i64: 1, 128>}, {transform_indices = @transform_4, window_bounds = array<i64: 1>}, {transform_indices = @transform_5, window_bounds = array<i64: 1, 16, 128>}, {transform_indices = @transform_6, window_bounds = array<i64: 1, 1, 8, 128>}]} {
    %c0_i32 = arith.constant 0 : i32
    %0 = arith.cmpi eq, %arg2, %c0_i32 : i32
    %1 = arith.extui %0 : i1 to i32
    %c0_i32_0 = arith.constant 0 : i32
    %2 = arith.cmpi ne, %1, %c0_i32_0 : i32
    scf.if %2 {
      %cst_11 = arith.constant 0.000000e+00 : f32
      %17 = vector.broadcast %cst_11 : f32 to vector<16x128xf32>
      %c0_12 = arith.constant 0 : index
      %c0_13 = arith.constant 0 : index
      %18 = vector.load %arg10[%c0_12, %c0_13] : memref<16x128xf32, #tpu.memory_space<vmem>>, vector<16x128xf32>
      tpu.vector_store %arg10[%c0_12, %c0_13], %17 {strides = array<i32>} : memref<16x128xf32, #tpu.memory_space<vmem>>, vector<16x128xf32>,
    } else {
    }
    %c0 = arith.constant 0 : index
    %c0_1 = arith.constant 0 : index
    %c0_2 = arith.constant 0 : index
    %3 = vector.load %arg4[%c0, %c0_1, %c0_2] : memref<1x16x16xbf16, #tpu.memory_space<vmem>>, vector<1x16x16xbf16>
    %4 = vector.shape_cast %3 : vector<1x16x16xbf16> to vector<16x16xbf16>
    %c16_i32 = arith.constant 16 : i32
    %5 = arith.muli %arg2, %c16_i32 : i32
    %6 = tpu.assume_multiple %5, 8 : i32
    %c0_3 = arith.constant 0 : index
    %7 = arith.index_cast %6 : i32 to index
    %c0_4 = arith.constant 0 : index
    %8 = vector.load %arg3[%c0_3, %7, %c0_4] : memref<1x16x128xbf16, #tpu.memory_space<vmem>>, vector<1x16x128xbf16>
    %9 = vector.shape_cast %8 : vector<1x16x128xbf16> to vector<16x128xbf16>
    %c0_5 = arith.constant 0 : index
    %c0_6 = arith.constant 0 : index
    %10 = vector.load %arg10[%c0_5, %c0_6] : memref<16x128xf32, #tpu.memory_space<vmem>>, vector<16x128xf32>
    %cst = arith.constant dense<0.000000e+00> : vector<16x128xf32>
    %11 = tpu.matmul %4, %9, %cst {dimension_numbers = #tpu.dot_dimension_numbers<[1], [0], [0], [1], [0, 0, 1, 1], [], []>} : vector<16x16xbf16>, vector<16x128xbf16>, vector<16x128xf32> -> vector<16x128xf32>
    %12 = arith.addf %10, %11 : vector<16x128xf32>
    %c0_7 = arith.constant 0 : index
    %c0_8 = arith.constant 0 : index
    %13 = vector.load %arg10[%c0_7, %c0_8] : memref<16x128xf32, #tpu.memory_space<vmem>>, vector<16x128xf32>
    tpu.vector_store %arg10[%c0_7, %c0_8], %12 {strides = array<i32>} : memref<16x128xf32, #tpu.memory_space<vmem>>, vector<16x128xf32>,
    %c0_i32_9 = arith.constant 0 : i32
    %14 = arith.cmpi eq, %arg2, %c0_i32_9 : i32
    %15 = arith.extui %14 : i1 to i32
    %c0_i32_10 = arith.constant 0 : i32
    %16 = arith.cmpi ne, %15, %c0_i32_10 : i32
    scf.if %16 {
      %c0_11 = arith.constant 0 : index
      %c0_12 = arith.constant 0 : index
      %17 = vector.load %arg10[%c0_11, %c0_12] : memref<16x128xf32, #tpu.memory_space<vmem>>, vector<16x128xf32>
      %18 = arith.truncf %17 : vector<16x128xf32> to vector<16x128xbf16>
      %c0_13 = arith.constant 0 : index
      %c0_14 = arith.constant 0 : index
      %19 = vector.load %arg5[%c0_13, %c0_14] : memref<128x128xbf16, #tpu.memory_space<vmem>>, vector<128x128xbf16>
      %cst_15 = arith.constant dense<0.000000e+00> : vector<16x128xf32>
      %20 = tpu.matmul %18, %19, %cst_15 {dimension_numbers = #tpu.dot_dimension_numbers<[1], [0], [0], [1], [0, 0, 1, 1], [], []>} : vector<16x128xbf16>, vector<128x128xbf16>, vector<16x128xf32> -> vector<16x128xf32>
      %c0_16 = arith.constant 0 : index
      %c0_17 = arith.constant 0 : index
      %21 = vector.load %arg6[%c0_16, %c0_17] : memref<1x128xf32, #tpu.memory_space<vmem>>, vector<1x128xf32>
      %22 = vector.broadcast %21 : vector<1x128xf32> to vector<16x128xf32>
      %23 = arith.addf %20, %22 : vector<16x128xf32>
      %c0_18 = arith.constant 0 : index
      %24 = memref.load %arg7[%c0_18] : memref<1xf32, #tpu.memory_space<smem>>
      %cst_19 = arith.constant 0.000000e+00 : f32
      %25 = vector.broadcast %cst_19 : f32 to vector<16x128xf32>
      %26 = arith.cmpf oge, %23, %25 : vector<16x128xf32>
      %27 = vector.broadcast %24 : f32 to vector<16x128xf32>
      %28 = arith.mulf %27, %23 : vector<16x128xf32>
      %29 = arith.select %26, %23, %28 : vector<16x128xi1>, vector<16x128xf32>
      %c16_i32_20 = arith.constant 16 : i32
      %30 = arith.muli %arg1, %c16_i32_20 : i32
      %31 = tpu.iota {dimensions = array<i32: 0>} : vector<16x128xi32>
      %32 = vector.broadcast %30 : i32 to vector<16x128xi32>
      %33 = arith.addi %32, %31 : vector<16x128xi32>
      %c16_i32_21 = arith.constant 16 : i32
      %34 = vector.broadcast %c16_i32_21 : i32 to vector<16x128xi32>
      %35 = arith.cmpi slt, %33, %34 : vector<16x128xi32>
      %cst_22 = arith.constant 0.000000e+00 : f32
      %36 = vector.broadcast %cst_22 : f32 to vector<16x128xf32>
      %37 = arith.select %35, %29, %36 : vector<16x128xi1>, vector<16x128xf32>
      %38 = arith.truncf %37 : vector<16x128xf32> to vector<16x128xbf16>
      %c0_23 = arith.constant 0 : index
      %c0_24 = arith.constant 0 : index
      %c0_25 = arith.constant 0 : index
      %39 = vector.load %arg8[%c0_23, %c0_24, %c0_25] : memref<1x16x128xbf16, #tpu.memory_space<vmem>>, vector<1x16x128xbf16>
      %40 = vector.shape_cast %39 : vector<1x16x128xbf16> to vector<16x128xbf16>
      %41 = vector.shape_cast %38 : vector<16x128xbf16> to vector<1x16x128xbf16>
      tpu.vector_store %arg8[%c0_23, %c0_24, %c0_25], %41 {strides = array<i32>} : memref<1x16x128xbf16, #tpu.memory_space<vmem>>, vector<1x16x128xbf16>,
      %cst_26 = arith.constant dense<0.000000e+00> : vector<128xf32>
      %42 = vector.multi_reduction <add>, %37, %cst_26 [0] : vector<16x128xf32> to vector<128xf32>
      %43 = vector.shape_cast %42 : vector<128xf32> to vector<1x128xf32>
      %44 = vector.shape_cast %43 : vector<1x128xf32> to vector<1x128xf32>
      %45 = vector.broadcast %44 : vector<1x128xf32> to vector<8x128xf32>
      %c0_27 = arith.constant 0 : index
      %c0_28 = arith.constant 0 : index
      %c0_29 = arith.constant 0 : index
      %c0_30 = arith.constant 0 : index
      %46 = vector.load %arg9[%c0_27, %c0_28, %c0_29, %c0_30] : memref<1x1x8x128xf32, #tpu.memory_space<vmem>>, vector<1x1x8x128xf32>
      %47 = vector.shape_cast %46 : vector<1x1x8x128xf32> to vector<8x128xf32>
      %48 = vector.shape_cast %45 : vector<8x128xf32> to vector<1x1x8x128xf32>
      tpu.vector_store %arg9[%c0_27, %c0_28, %c0_29, %c0_30], %48 {strides = array<i32>} : memref<1x1x8x128xf32, #tpu.memory_space<vmem>>, vector<1x1x8x128xf32>,
    } else {
    }
    return
  }
  func.func @transform_0(%arg0: i32, %arg1: i32, %arg2: i32) -> (i32, i32, i32) {
    %c0_i32 = arith.constant 0 : i32
    %c0_i32_0 = arith.constant 0 : i32
    %c0_i32_1 = arith.constant 0 : i32
    return %arg0, %c0_i32, %c0_i32_0 : i32, i32, i32
  }
  func.func @transform_1(%arg0: i32, %arg1: i32, %arg2: i32) -> (i32, i32, i32) {
    %c0_i32 = arith.constant 0 : i32
    return %arg0, %arg1, %arg2 : i32, i32, i32
  }
  func.func @transform_2(%arg0: i32, %arg1: i32, %arg2: i32) -> (i32, i32) {
    %c0_i32 = arith.constant 0 : i32
    %c0_i32_0 = arith.constant 0 : i32
    %c0_i32_1 = arith.constant 0 : i32
    return %c0_i32, %c0_i32_0 : i32, i32
  }
  func.func @transform_3(%arg0: i32, %arg1: i32, %arg2: i32) -> (i32, i32) {
    %c0_i32 = arith.constant 0 : i32
    %c0_i32_0 = arith.constant 0 : i32
    %c0_i32_1 = arith.constant 0 : i32
    return %c0_i32, %c0_i32_0 : i32, i32
  }
  func.func @transform_4(%arg0: i32, %arg1: i32, %arg2: i32) -> i32 {
    %c0_i32 = arith.constant 0 : i32
    %c0_i32_0 = arith.constant 0 : i32
    return %c0_i32 : i32
  }
  func.func @transform_5(%arg0: i32, %arg1: i32, %arg2: i32) -> (i32, i32, i32) {
    %c0_i32 = arith.constant 0 : i32
    %c0_i32_0 = arith.constant 0 : i32
    return %arg0, %arg1, %c0_i32 : i32, i32, i32
  }
  func.func @transform_6(%arg0: i32, %arg1: i32, %arg2: i32) -> (i32, i32, i32, i32) {
    %c0_i32 = arith.constant 0 : i32
    %c0_i32_0 = arith.constant 0 : i32
    %c0_i32_1 = arith.constant 0 : i32
    return %arg0, %arg1, %c0_i32, %c0_i32_0 : i32, i32, i32, i32
  }
}

</mosaic_0001>

<bundles_post_ra>
// kernel: tpu_custom_call.1
= control target key start
LH: loop header
LB: loop body
LE: loop exit
PB: predicated region body
PF: predicated region fallthrough
CT: control target
= control target key end

     0   :  { %s1547_s0 = inlined_call_operand.hbm [shape: bf16[2,16,128], index: 0, kind: input, shape index: {}]   ;;  %s1548_s1 = inlined_call_operand.hbm [shape: bf16[2,16,16], index: 1, kind: input, shape index: {}]   ;;  %s1549_s2 = inlined_call_operand.hbm [shape: bf16[128,128], index: 2, kind: input, shape index: {}]   ;;  %s1550_s3 = inlined_call_operand.vmem [shape: f32[1,128], index: 3, kind: input, shape index: {}]   ;;  %s1551_s4 = inlined_call_operand.<no memory space> [shape: f32[1], index: 4, kind: input, shape index: {}]   ;;  %s1552_s5 = inlined_call_operand.hbm [shape: bf16[2,16,128], index: 5, kind: output, shape index: {0}]   ;;  %s1553_s6 = inlined_call_operand.hbm [shape: f32[2,1,8,128], index: 6, kind: output, shape index: {1}]  }
   0x1   :  { %1563 = sst [smem:[#allocation20_spill]] %s1547_s0 }
   0x2   :  { %1564 = sst [smem:[#allocation21_spill]] %s1549_s2 }
   0x3   :  { %12 = sst [smem:[#allocation3]] %s1551_s4 }
   0x4   :  { %13 = vsyncpa [#allocation5], 0 }
   0x5   :  { %15 = vsyncpa [#allocation5 + $0x1], 0 }
   0x6   :  { %16 = vsyncpa [#allocation8], 0 }
   0x7   :  { %18 = vsyncpa [#allocation8 + $0x1], 0 }
   0x8   :  { %19 = vsyncpa [#allocation6], 0 }
   0x9   :  { %21 = vsyncpa [#allocation6 + $0x1], 0 }
   0xa   :  { %22 = vsyncpa [#allocation12], 0 }
   0xb   :  { %24 = vsyncpa [#allocation12 + $0x1], 0  ;;  %s1239_s23 = smov 0   ;;  %s1241_s24 = smov 0  }
   0xc   :  { %s1243_s25 = smov 0   ;;  %s1245_s26 = smov 0  }
   0xd   :  { %s1247_s27 = smov 0   ;;  %s1249_s28 = smov 0  }
   0xe LB: > { %1565 = sst [smem:[#allocation18_spill]] %s1184_s27  ;;  %s1270_s4 = sadd.s32 4294967295, %s1188_s28   ;;  %s1188_s28 = sphi %s1249_s28, %s30_s28   ;;  %s1184_s27 = sphi %s1247_s27, %s1586_s27   ;;  %s1180_s26 = sphi %s1245_s26, %s1585_s26   ;;  %s1176_s25 = sphi %s1243_s25, %s1589_s25   ;;  %s1172_s24 = sphi %s1241_s24, %s1588_s24   ;;  %s1168_s23 = sphi %s1239_s23, %s1587_s23  }
   0xf   : > { %s795_s29 = sadd.s32 4294967294, %s1188_s28   ;;  %p69_p0 = scmp.ne.s32.totalorder %s1172_s24, %s1168_s23 }
  0x10   : > { %p1554_p1 = scmp.eq.s32.totalorder %s1270_s4, 0  ;;  %p194_p3 = scmp.eq.s32.totalorder %s795_s29, 1 }
  0x11   : > { %p796_p5 = scmp.ge.s32.totalorder %s1188_s28, 1  ;;  %p229_p7 = scmp.lt.s32.totalorder %s1188_s28, 3 }
  0x12   : > { %p1279_p4 = por %p1554_p1, %p69_p0  ;;  %p1284_p6 = por %p194_p3, %p69_p0 }
  0x13   : > { %p1289_p8 = pnand %p796_p5, %p229_p7  ;;  %s1190_s9 = smov [#allocation9]  }
  0x14   : > { %s1566_s30 = scalar_select %p1279_p4, 1, 0 }
  0x15   : > { %s1567_s7 = scalar_select %p1284_p6, 1, 0 }
  0x16   : > { %s1568_s8 = scalar_select %p1289_p8, 1, 0 }
  0x17   : > { %s241_s10 = sshll.u32 %s1190_s9, 4  ;;  %p891_p9 = pneg %p1289_p8  ;;  %s242_s10 = int_to_ptr.vmem [resolvable:$true] %s241_s10 }
  0x18   : > { %s49_s12 = sadd.s32 1, %s1184_s27  ;;  %s1570_s2 = sld [smem:[#allocation21_spill]] }
  0x19   : > { %p1298_p11 = pnand %p891_p9, %p1554_p1 }
  0x1b   : > { %p980_p13 = pneg %p1298_p11 }
  0x1e   : > { %s978_s15 = scalar_lea.hbm %s1570_s2, 1024 }
  0x1f   : > { %p979_p12 = scmp.ne.s32.totalorder %s1570_s2, %s978_s15  ;;  %p985_p5 = scmp.lt.u32.totalorder %s978_s15, %s1570_s2 }
  0x21   : > { %p981_p0 = pnand %p980_p13, %p979_p12 }
  0x23   : > { %p982_p3 = pneg %p981_p0 }
  0x25   : > { %p987_p7 = pnand %p985_p5, %p982_p3 }
  0x27   : > { %990 = shalt.err (!%p987_p7)
}
  0x28   : > { %s991_s20 = scalar_lea.vmem %s242_s10, 1024  ;;  %p999_p2 = scmp.lt.s32.totalorder %s242_s10, %s242_s10 }
  0x29   : > { %p992_p9 = scmp.ne.s32.totalorder %s242_s10, %s991_s20  ;;  %p1000_p6 = scmp.lt.s32.totalorder %s991_s20, %s991_s20 }
  0x2b   : > { %p994_p10 = pnand %p992_p9, %p980_p13  ;;  %p1001_p4 = por %p1000_p6, %p999_p2 }
  0x2d   : > { %p995_p1 = pneg %p994_p10 }
  0x2f   : > { %p1002_p8 = pnand %p1001_p4, %p995_p1 }
  0x31   : > { %1005 = shalt.err (!%p1002_p8)
}
  0x32   : > { %s1557_s21 = smov 64   ;;  %s1559_s22 = smov 4  }
  0x33   : > { %894 = dma.hbm_to_vmem [thread:$0]  (!%p1298_p11), %s1570_s2, 1024, %s242_s10, [#allocation8], %s1557_s21, %s1557_s21, %s1559_s22  }
  0x34   : > { %p51_p1 = scmp.ge.s32.totalorder %s49_s12, 2  ;;  %s56_s13 = sadd.s32 1, %s1176_s25 }
  0x35   : > { %p63_p2 = scmp.ne.s32.totalorder %s1176_s25, %s1172_s24  ;;  %p64_p4 = scmp.eq.s32.totalorder %s1188_s28, 0 }
  0x36   : > { %s1591_s12 = smov (%p51_p1, %s49_s12), 0  ;;  %p1573_p8 = scmp.eq.s32.totalorder %s1270_s4, 1 }
  0x37   : > { %1571 = sst [smem:[#allocation19_spill]] %s1591_s12  ;;  %p1328_p6 = por %p64_p4, %p63_p2 }
  0x38   : > { %p1334_p10 = por %p1573_p8, %p63_p2  ;;  %s53_s15 = ssub.s32 %s1184_s27, %s1591_s12 }
  0x39   : > { %p910_p12 = scmp.lt.s32.totalorder %s1188_s28, 2  ;;  %p54_p11 = scmp.eq.s32.totalorder %s53_s15, 0 }
  0x3a   : > { %s261_s10 = sand.u32 1, %s1176_s25   ;;  %s832_s18 = sshll.u32 %s1184_s27, 7 }
  0x3b   : > { %s799_s16 = sshll.u32 %s261_s10, 3  ;;  %s1575_s0 = sld [smem:[#allocation20_spill]] }
  0x3c   : > { %s1343_s17 = scalar_select %p54_p11, %s1176_s25, %s56_s13  }
  0x3d   : > { %s265_s9 = scalar_lea.vmem [#allocation4], %s799_s16  ;;  %p1355_p13 = pnand %p910_p12, %p1328_p6 }
  0x3e   : > { %s272_s21 = sshll.u32 %s265_s9, 4  ;;  %s1362_s19 = scalar_lea.hbm %s1548_s1, %s832_s18  ;;  %s1351_s21 = int_to_ptr.vmem [resolvable:$true] %s272_s21 }
  0x3f   : > { %s286_s20 = scalar_lea.vmem [#allocation7], %s799_s16  ;;  %s1366_s12 = scalar_lea.sflag [#allocation5], %s261_s10 }
  0x40   : > { %s1364_s2 = sshll.u32 %s286_s20, 4  ;;  %p1008_p3 = pneg %p1355_p13  ;;  %s1398_s2 = int_to_ptr.vmem [resolvable:$true] %s1364_s2 }
  0x41   : > { %s1349_s29 = scalar_lea.hbm %s1575_s0, %s832_s18  ;;  %s1011_s22 = scalar_lea.hbm %s1575_s0, 256 }
  0x42   : > { %s1006_s9 = scalar_lea.hbm %s1349_s29, 128  ;;  %p1012_p9 = scmp.lt.u32.totalorder %s1349_s29, %s1575_s0 }
  0x43   : > { %p1007_p0 = scmp.ne.s32.totalorder %s1349_s29, %s1006_s9  ;;  %p1013_p1 = scmp.lt.u32.totalorder %s1011_s22, %s1006_s9 }
  0x44   : > { %p1015_p4 = scmp.lt.u32.totalorder %s1006_s9, %s1349_s29 }
  0x45   : > { %p1009_p5 = pnand %p1008_p3, %p1007_p0  ;;  %p1014_p2 = por %p1013_p1, %p1012_p9 }
  0x47   : > { %p1010_p7 = pneg %p1009_p5  ;;  %p1016_p6 = por %p1015_p4, %p1014_p2 }
  0x49   : > { %p1017_p8 = pnand %p1016_p6, %p1010_p7 }
  0x4b   : > { %1020 = shalt.err (!%p1017_p8)
}
  0x4c   : > { %s1021_s10 = scalar_lea.vmem %s1351_s21, 128  ;;  %s1193_s27 = smov [#allocation4]  }
  0x4d   : > { %p1022_p12 = scmp.ne.s32.totalorder %s1351_s21, %s1021_s10  ;;  %s1026_s16 = sshll.u32 %s1193_s27, 4  ;;  %s1027_s16 = int_to_ptr.vmem [resolvable:$false] %s1026_s16 }
  0x4e   : > { %s1028_s20 = scalar_lea.vmem %s1027_s16, 256  ;;  %p1029_p5 = scmp.lt.s32.totalorder %s1351_s21, %s1027_s16 }
  0x4f   : > { %p1024_p11 = pnand %p1022_p12, %p1008_p3  ;;  %p1030_p9 = scmp.lt.s32.totalorder %s1028_s20, %s1021_s10 }
  0x51   : > { %p1025_p0 = pneg %p1024_p11  ;;  %p1031_p1 = por %p1030_p9, %p1029_p5 }
  0x53   : > { %p1032_p2 = pnand %p1031_p1, %p1025_p0 }
  0x55   : > { %1035 = shalt.err (!%p1032_p2)
}
  0x56   : > { %s1577_s9 = smov 4   ;;  %s1578_s14 = smov 64  }
  0x57   : > { %898 = dma.hbm_to_vmem [thread:$0]  (!%p1355_p13), %s1349_s29, 128, %s1351_s21, %s1366_s12, %s1578_s14, %s1578_s14, %s1577_s9  }
  0x58   : > { %s282_s22 = sand.u32 1, %s1188_s28   ;;  %s1036_s18 = scalar_lea.hbm %s1362_s19, 128 }
  0x59   : > { %s1401_s13 = scalar_lea.sflag [#allocation8], %s282_s22  ;;  %p1037_p7 = scmp.ne.s32.totalorder %s1362_s19, %s1036_s18 }
  0x5a   : > { %s1041_s16 = scalar_lea.hbm %s1548_s1, 256  ;;  %p1042_p8 = scmp.lt.u32.totalorder %s1362_s19, %s1548_s1 }
  0x5b   : > { %p1039_p4 = pnand %p1037_p7, %p1008_p3  ;;  %p1043_p12 = scmp.lt.u32.totalorder %s1041_s16, %s1036_s18 }
  0x5c   : > { %p1045_p0 = scmp.lt.u32.totalorder %s1036_s18, %s1362_s19 }
  0x5d   : > { %p1040_p6 = pneg %p1039_p4  ;;  %p1044_p11 = por %p1043_p12, %p1042_p8 }
  0x5f   : > { %p1046_p5 = por %p1045_p0, %p1044_p11 }
  0x61   : > { %p1047_p9 = pnand %p1046_p5, %p1040_p6 }
  0x63   : > { %1050 = shalt.err (!%p1047_p9)
}
  0x64   : > { %s1051_s12 = scalar_lea.vmem %s1398_s2, 128  ;;  %s1194_s21 = smov [#allocation7]  }
  0x65   : > { %p1052_p1 = scmp.ne.s32.totalorder %s1398_s2, %s1051_s12  ;;  %s1056_s29 = sshll.u32 %s1194_s21, 4  ;;  %s1057_s29 = int_to_ptr.vmem [resolvable:$false] %s1056_s29 }
  0x66   : > { %s1058_s0 = scalar_lea.vmem %s1057_s29, 256  ;;  %p1059_p4 = scmp.lt.s32.totalorder %s1398_s2, %s1057_s29 }
  0x67   : > { %p1054_p2 = pnand %p1052_p1, %p1008_p3  ;;  %p1060_p8 = scmp.lt.s32.totalorder %s1058_s0, %s1051_s12 }
  0x69   : > { %p1055_p7 = pneg %p1054_p2  ;;  %p1061_p12 = por %p1060_p8, %p1059_p4 }
  0x6b   : > { %p1062_p11 = pnand %p1061_p12, %p1055_p7 }
  0x6d   : > { %1065 = shalt.err (!%p1062_p11)
}
  0x6e   : > { %901 = dma.hbm_to_vmem [thread:$0]  (!%p1355_p13), %s1362_s19, 128, %s1398_s2, %s1401_s13, %s1578_s14, %s1578_s14, %s1577_s9  }
  0x6f   : > { %p1579_p3 = scmp.ne.s32.totalorder %s1568_s8, 0 }
  0x70   : > { %s1433_s22 = sand.u32 (!%p1579_p3), 1, %s1172_s24   ;;  %p1580_p6 = scmp.ne.s32.totalorder (!%p1579_p3), %s1566_s30, 0 }
  0x71   : > { %308 = sbr.rel (%p1579_p3) target bundleno = 609 (0x261), region = 40  ;;  %s1436_s18 = sshll.u32 (!%p1579_p3), %s1433_s22, 3 }
  0x72   : > { %s311_s15 = scalar_lea.sflag (!%p1579_p3), [#allocation5], %s1433_s22  ;;  %s314_s10 = scalar_lea.vmem (!%p1579_p3), [#allocation4], %s1436_s18 }
  0x78   : > { %1147 = dma.done.wait (%p1580_p6), %s311_s15, 128  }
  0x79   : > { %1149 = vsyncadd (%p1580_p6), %s311_s15, 4294967168  ;;  %s319_s2 = sand.u32 1, %s1270_s4   ;;  %s323_s19 = scalar_lea.vmem [#allocation7], %s1436_s18 }
  0x7a   : > { %s320_s8 = scalar_lea.sflag [#allocation8], %s319_s2 }
  0x7b   : > { %1151 = dma.done.wait (%p1580_p6), %s320_s8, 128  }
  0x7c   : > { %1153 = vsyncadd (%p1580_p6), %s320_s8, 4294967168  ;;  %p1581_p13 = scmp.eq.s32.totalorder %s1270_s4, 0 }
  0x7e   : > { %1155 = dma.done.wait (%p1581_p13), [#allocation8], 1024   ;;  %p1582_p0 = pmov %p1581_p13 }
  0x7f   : > { %v1195_v0 = vmov 0.0   ;;  %vm1196_vm0 = vmmov 0   ;;  %v968_v1 = vld [vmem:[%s314_s10] sm:$0xff]   ;;  %v969_v2 = vld [vmem:[%s323_s19] sm:$0xff]   ;;  %vm397_vm1 = vcmask 130048   ;;  %s564_s4 = sld [smem:[#allocation3]] }
  0x80   : > { %1157 = vsyncadd (%p1582_p0), [#allocation8], 4294966272  ;;  %853 = vmatprep.subr.bf16.mxu0 %v1195_v0  ;;  %855 = vmatprep.mubr.msk.bf16.mxu0 %vm1196_vm0, %v1195_v0  ;;  %v970_v3 = vld [vmem:[#allocation9] sm:$0xff]   ;;  %v971_v4 = vld [vmem:[#allocation9 + $0x8] sm:$0xff]   ;;  %s836_s14 = sshll.u32 %s1180_s26, 7  ;;  %s358_s13 = scalar_lea.vmem [#allocation10], %s1436_s18 }
  0x81   : > { %859 = vmatprep.subr.bf16.mxu1 %v1195_v0  ;;  %875 = vmatprep.mubr.msk.bf16.mxu1 %vm1196_vm0, %v1195_v0  ;;  %v972_v5 = vld [vmem:[#allocation9 + $0x10] sm:$0xff]   ;;  %v973_v6 = vld [vmem:[#allocation9 + $0x18] sm:$0xff]   ;;  %v974_v7 = vld [vmem:[#allocation9 + $0x20] sm:$0xff]   ;;  %s622_s27 = sshll.u32 %s358_s13, 4  ;;  %s1464_s12 = scalar_lea.hbm %s1552_s5, %s836_s14  ;;  %s1466_s27 = int_to_ptr.vmem [resolvable:$true] %s622_s27 }
  0x82   : > { %854 = vmatpush3.bf16.msra.mxu0 %v968_v1  ;;  %860 = vmatpush3.bf16.msra.mxu1 %v970_v3  ;;  %v975_v8 = vld [vmem:[#allocation9 + $0x28] sm:$0xff]   ;;  %v976_v9 = vld [vmem:[#allocation9 + $0x30] sm:$0xff]   ;;  %v977_v10 = vld [vmem:[#allocation9 + $0x38] sm:$0xff]   ;;  %s602_s21 = scalar_lea.sflag [#allocation6], %s1433_s22  ;;  %s1066_s29 = scalar_lea.vmem %s1466_s27, 128 }
  0x83   : > { %861 = vmatprep.subr.bf16.mxu1 %v1195_v0  ;;  %v814_v16 = vld [vmem:[%s1550_s3] ss:$0 sm:$0xff]  ;;  %p1067_p5 = scmp.ne.s32.totalorder %s1466_s27, %s1066_s29  ;;  %s1197_s0 = smov [#allocation10]  }
  0x84   : > { %s1070_s15 = sshll.u32 %s1197_s0, 4  ;;  %s1071_s15 = int_to_ptr.vmem [resolvable:$false] %s1070_s15 }
  0x85   : > { %856 = vmatmul.mubr.msk.bf16.vlgmr.msra.gmra.mrb[0].mxu0 %vm397_vm1, %v969_v2  ;;  %v567_v18 = vstv %s564_s4  ;;  %p1068_p9 = pnand %p1067_p5, %p1334_p10  ;;  %s1072_s10 = scalar_lea.vmem %s1071_s15, 256 }
  0x86   : > { %862 = vmatpush3.bf16.msra.mxu1 %v971_v4  ;;  %p1073_p2 = scmp.lt.s32.totalorder %s1466_s27, %s1071_s15  ;;  %p1074_p7 = scmp.lt.s32.totalorder %s1072_s10, %s1066_s29 }
  0x87   : > { %863 = vmatprep.subr.bf16.mxu1 %v1195_v0  ;;  %p1069_p1 = pneg %p1068_p9 }
  0x88   : > { %p1075_p4 = por %p1074_p7, %p1073_p2 }
  0x8a   : > { %864 = vmatpush3.bf16.msra.mxu1 %v972_v5  ;;  %p1076_p8 = pnand %p1075_p4, %p1069_p1 }
  0x8b   : > { %865 = vmatprep.subr.bf16.mxu1 %v1195_v0 }
  0x8e   : > { %866 = vmatpush3.bf16.msra.mxu1 %v973_v6 }
  0x8f   : > { %867 = vmatprep.subr.bf16.mxu1 %v1195_v0 }
  0x92   : > { %868 = vmatpush3.bf16.msra.mxu1 %v974_v7 }
  0x93   : > { %869 = vmatprep.subr.bf16.mxu1 %v1195_v0 }
  0x96   : > { %870 = vmatpush3.bf16.msra.mxu1 %v975_v8 }
  0x97   : > { %871 = vmatprep.subr.bf16.mxu1 %v1195_v0 }
  0x9a   : > { %872 = vmatpush3.bf16.msra.mxu1 %v976_v9 }
  0x9b   : > { %873 = vmatprep.subr.bf16.mxu1 %v1195_v0 }
  0x9e   : > { %874 = vmatpush3.bf16.msra.mxu1 %v977_v10 }
 0x158   : > { %v435_v11 = vpop.f32.mrb[0].mxu0 }
 0x159   : > { %v857_v12 = vpop.f32.mrb[1].mxu0 }
 0x15a   : > { %v438_v13 = vpop.f32.mrb[2].mxu0 }
 0x15b   : > { %v451_v14 = vpack.c.bf16 %v438_v13, %v435_v11  ;;  %v858_v15 = vpop.f32.mrb[3].mxu0 }
 0x15d   : > { %876 = vmatmul.mubr.bf16.vlgmr.msra.gmra.mrb[0].mxu1 %v451_v14 }
 0x230   : > { %v557_v17 = vpop.f32.mrb[0].mxu1 }
 0x231   : > { %v558_v19 = vadd.f32 %v814_v16, %v557_v17  ;;  %v877_v20 = vpop.f32.mrb[1].mxu1 }
 0x232   : > { %v560_v21 = vpop.f32.mrb[2].mxu1 }
 0x233   : > { %v568_v22 = vmul.f32 %v567_v18, %v558_v19  ;;  %v561_v23 = vadd.f32 %v814_v16, %v560_v21  ;;  %v878_v24 = vpop.f32.mrb[3].mxu1  ;;  %vm565_vm2 = vcmp.ge.f32.partialorder %v558_v19, 0.0 }
 0x235   : > { %vm566_vm3 = vcmp.ge.f32.partialorder %v561_v23, 0.0  ;;  %v569_v25 = vmul.f32 %v567_v18, %v561_v23  ;;  %v570_v26 = vsel %vm565_vm2, %v558_v19, %v568_v22 }
 0x237   : > { %v571_v27 = vsel %vm566_vm3, %v561_v23, %v569_v25 }
 0x238   : > { %v840_v28 = vpack.c.bf16 %v571_v27, %v570_v26  ;;  %v593_v29 = vadd.f32 %v571_v27, %v570_v26 }
 0x23a   : > { %841 = vst [vmem:[%s358_s13] sm:$0xff] %v840_v28   ;;  %v594_v30 = vrot.slane %v593_v29, 4 }
 0x23b   : > { %1079 = shalt.err (!%p1076_p8)
}
 0x23c   : > { %s1080_s2 = scalar_lea.hbm %s1464_s12, 128  ;;  %s1084_s4 = scalar_lea.hbm %s1552_s5, 256 }
 0x23d   : > { %p1081_p12 = scmp.ne.s32.totalorder %s1464_s12, %s1080_s2  ;;  %p1085_p6 = scmp.lt.u32.totalorder %s1464_s12, %s1552_s5 }
 0x23e   : > { %p1086_p13 = scmp.lt.u32.totalorder %s1084_s4, %s1080_s2  ;;  %p1088_p5 = scmp.lt.u32.totalorder %s1080_s2, %s1464_s12 }
 0x23f   : > { %p1082_p11 = pnand %p1081_p12, %p1334_p10 }
 0x240   : > { %p1087_p0 = por %p1086_p13, %p1085_p6 }
 0x241   : > { %p1083_p3 = pneg %p1082_p11 }
 0x242   : > { %p1089_p9 = por %p1088_p5, %p1087_p0 }
 0x244   : > { %p1090_p1 = pnand %p1089_p9, %p1083_p3 }
 0x246   : > { %1093 = shalt.err (!%p1090_p1)
}
 0x247   : > { %s1198_s13 = smov 64   ;;  %s1199_s16 = smov 4   ;;  %v595_v31 = vadd.f32 %v594_v30, %v593_v29 }
 0x248   : > { %887 = dma.vmem_to_hbm [thread:$0]  (%p1334_p10), %s1466_s27, 128, %s1464_s12, %s602_s21, %s1198_s13, %s1198_s13, %s1199_s16  }
 0x249   : > { %v596_v32 = vrot.slane %v595_v31, 2  ;;  %s365_s20 = scalar_lea.vmem [#allocation11], %s1436_s18  ;;  %s1498_s10 = scalar_lea.hbm %s1553_s6, %s836_s14 }
 0x24a   : > { %s639_s29 = sshll.u32 %s365_s20, 4  ;;  %s607_s27 = scalar_lea.sflag [#allocation12], %s1433_s22  ;;  %s1500_s29 = int_to_ptr.vmem [resolvable:$true] %s639_s29 }
 0x24b   : > { %v597_v33 = vadd.f32 %v596_v32, %v595_v31  ;;  %s1094_s12 = scalar_lea.vmem %s1500_s29, 128  ;;  %s1200_s18 = smov [#allocation11]  }
 0x24c   : > { %p1095_p2 = scmp.ne.s32.totalorder %s1500_s29, %s1094_s12  ;;  %s1098_s21 = sshll.u32 %s1200_s18, 4  ;;  %s1099_s21 = int_to_ptr.vmem [resolvable:$false] %s1098_s21 }
 0x24d   : > { %v598_v34 = vrot.slane %v597_v33, 1  ;;  %s1100_s26 = scalar_lea.vmem %s1099_s21, 256  ;;  %p1101_p8 = scmp.lt.s32.totalorder %s1500_s29, %s1099_s21 }
 0x24e   : > { %p1096_p7 = pnand %p1095_p2, %p1334_p10  ;;  %p1102_p12 = scmp.lt.s32.totalorder %s1100_s26, %s1094_s12 }
 0x24f   : > { %v599_v35 = vadd.f32 %v598_v34, %v597_v33 }
 0x250   : > { %p1097_p4 = pneg %p1096_p7  ;;  %p1103_p11 = por %p1102_p12, %p1101_p8 }
 0x251   : > { %600 = vst [vmem:[%s365_s20] sm:$0xff] %v599_v35 }
 0x252   : > { %p1104_p3 = pnand %p1103_p11, %p1097_p4 }
 0x254   : > { %1107 = shalt.err (!%p1104_p3)
}
 0x255   : > { %s1108_s22 = scalar_lea.hbm %s1498_s10, 128  ;;  %s1112_s8 = scalar_lea.hbm %s1553_s6, 256 }
 0x256   : > { %p1109_p6 = scmp.ne.s32.totalorder %s1498_s10, %s1108_s22  ;;  %p1113_p5 = scmp.lt.u32.totalorder %s1498_s10, %s1553_s6 }
 0x257   : > { %p1114_p9 = scmp.lt.u32.totalorder %s1112_s8, %s1108_s22  ;;  %p1116_p2 = scmp.lt.u32.totalorder %s1108_s22, %s1498_s10 }
 0x258   : > { %p1110_p13 = pnand %p1109_p6, %p1334_p10 }
 0x259   : > { %p1115_p1 = por %p1114_p9, %p1113_p5 }
 0x25a   : > { %p1111_p0 = pneg %p1110_p13 }
 0x25b   : > { %p1117_p7 = por %p1116_p2, %p1115_p1 }
 0x25d   : > { %p1118_p4 = pnand %p1117_p7, %p1111_p0 }
 0x25f   : > { %1121 = shalt.err (!%p1118_p4)
}
 0x260   : > { %888 = dma.vmem_to_hbm [thread:$0]  (%p1334_p10), %s1500_s29, 128, %s1498_s10, %s607_s27  }
 0x261 PF: > { %s651_s30 = sand.u32 1, %s1168_s23   ;;  %p1583_p8 = scmp.ne.s32.totalorder %s1567_s7, 0 }
 0x262   : > { %p1584_p12 = scmp.ge.s32.totalorder %s1188_s28, 2  ;;  %s652_s9 = scalar_lea.sflag [#allocation6], %s651_s30 }
 0x264   : > { %p903_p11 = pnand %p1584_p12, %p1583_p8 }
 0x266   : > { %1159 = dma.done.wait (!%p903_p11), %s652_s9, 128  }
 0x267   : > { %1161 = vsyncadd (!%p903_p11), %s652_s9, 4294967168  ;;  %s661_s13 = scalar_lea.sflag [#allocation12], %s651_s30 }
 0x268   : > { %1163 = dma.done.wait (!%p903_p11), %s661_s13, 128  }
 0x269   : > { %1165 = vsyncadd (!%p903_p11), %s661_s13, 4294967168  ;;  %s30_s28 = sadd.s32 1, %s1188_s28   ;;  %s1585_s26 = sld [smem:[#allocation18_spill]] }
 0x26a   : > { %p27_p3 = scmp.ge.s32.totalorder %s30_s28, 4   ;;  %s1586_s27 = sld [smem:[#allocation19_spill]] }
 0x26b   : > { %s1587_s23 = smov %s1172_s24  ;;  %s1588_s24 = smov %s1176_s25 }
 0x26c   : > { %s1589_s25 = smov %s1343_s17  ;;  %29 = sbr.rel (!%p27_p3) target bundleno = 14 (0xe), region = 128 }
 0x273   :  { %666 = vsyncpa [#allocation5], 1 }
 0x274   :  { %668 = vsyncpa [#allocation5 + $0x1], 1 }
 0x275   :  { %669 = vsyncpa [#allocation8], 1 }
 0x276   :  { %671 = vsyncpa [#allocation8 + $0x1], 1 }
 0x277   :  { %672 = vsyncpa [#allocation6], 1 }
 0x278   :  { %674 = vsyncpa [#allocation6 + $0x1], 1 }
 0x279   :  { %675 = vsyncpa [#allocation12], 1 }
 0x27a   :  { %677 = vsyncpa [#allocation12 + $0x1], 1 }

</bundles_post_ra>
